<compile_context>
chip_gen: v5e
topology: v5e:2x2
jax: 0.10.0
libtpu: 0.0.40
codegen_flags: <defaults>
</compile_context>

<pallas_src>
import functools

import jax
import jax.numpy as jnp
from jax.experimental import pallas as pl
from jax.experimental.pallas import tpu as pltpu


# Conservative VMEM budget: v7x has only 64 MiB physical / 32 MiB default
# scoped per TensorCore, so size all tiles (incl. double buffers) under 24 MiB.
_VMEM_BUDGET_BYTES = 24 * 1024 * 1024
_VMEM_LIMIT_BYTES = 32 << 20          # raises v5e's 16 MiB default, safe on v7x
_TM_MAX, _TN_MAX, _TK_MAX = 512, 512, 1024


def _round_up(x: int, m: int) -> int:
    return ((x + m - 1) // m) * m


def _largest_aligned_divisor(dim_aligned: int, align: int, max_tile: int) -> int:
    """Largest multiple of `align` that divides `dim_aligned` and is <= max_tile."""
    max_tile = max(align, min(max_tile, dim_aligned))
    best = align
    for cand in range(align, max_tile + 1, align):
        if dim_aligned % cand == 0:
            best = cand
    return best


# ---------------------------------------------------------------------------
# Kernels
# ---------------------------------------------------------------------------
def _resident_kernel(x_ref, w_ref, b_ref, o_ref):
    # x_ref: [tm, D]   w_ref: [D, C] (VMEM-resident, DMA'd once)
    # b_ref: [1, C]    o_ref: [tm, C]
    acc = jnp.dot(x_ref[...], w_ref[...], preferred_element_type=jnp.float32)
    o_ref[...] = (acc + b_ref[...]).astype(o_ref.dtype)


def _tiled_kernel(x_ref, w_ref, b_ref, o_ref):
    # x_ref: [tm, tk]  w_ref: [tk, tn]  b_ref: [1, tn]  o_ref: [tm, tn] (f32)
    # The output block itself is the accumulator: its index is constant across
    # the K axis, so it stays resident in VMEM and is written back once.
    k = pl.program_id(2)

    @pl.when(k == 0)
    def _():
        o_ref[...] = jnp.zeros_like(o_ref)

    o_ref[...] += jnp.dot(x_ref[...], w_ref[...],
                          preferred_element_type=jnp.float32)

    @pl.when(k == pl.num_programs(2) - 1)
    def _():
        o_ref[...] += b_ref[...]   # bias added exactly once, in the finalize


# ---------------------------------------------------------------------------
# Planners (trace-time, pure Python on static shapes)
# ---------------------------------------------------------------------------
def _plan_resident(B, D, C, in_esize, out_esize):
    """Return tm for the weight-resident path, or None if the weight won't fit."""
    B_al = _round_up(B, 8)
    # Count 2 buffers even for constant-index blocks (conservative).
    w_bytes = 2 * _round_up(D, 8) * _round_up(C, 128) * in_esize
    b_bytes = 2 * 8 * _round_up(C, 128) * 4
    if w_bytes + b_bytes > 0.75 * _VMEM_BUDGET_BYTES:
        return None
    # Keep >=2 M grid steps when possible so v7x's two TensorCores both work.
    tm_cap = B_al if B_al < 16 else min(_TM_MAX, _round_up((B_al + 1) // 2, 8))
    for tm in (512, 256, 128, 64, 32, 16, 8):
        if tm > tm_cap:
            continue
        x_bytes = 2 * tm * _round_up(D, 128) * in_esize
        o_bytes = 2 * tm * _round_up(C, 128) * out_esize
        if w_bytes + b_bytes + x_bytes + o_bytes <= _VMEM_BUDGET_BYTES:
            return tm
    return None


def _plan_tiled(B, D, C):
    """Pick (tm, tn, tk, D_pad) for the (M, N, K)-tiled path."""
    B_al, D_al, C_al = _round_up(B, 8), _round_up(D, 128), _round_up(C, 128)
    tk = _largest_aligned_divisor(D_al, 128, _TK_MAX)
    # If D only has tiny aligned divisors, prefer a modest zero-pad of D over
    # many tiny K steps (per-grid-step overhead ~0.35 us).
    if tk < 512 <= D_al and _round_up(D_al, 512) - D_al <= D_al // 8:
        tk = 512
    D_pad = _round_up(D_al, tk)
    tn = _largest_aligned_divisor(C_al, 128, _TN_MAX)
    tm = _largest_aligned_divisor(B_al, 8, _TM_MAX)
    if pl.cdiv(C, tn) == 1 and B_al >= 16:
        # Keep >=2 parallel grid steps for v7x's two TensorCores.
        tm = min(tm, _largest_aligned_divisor(
            B_al, 8, max(8, _round_up((B_al + 1) // 2, 8))))
    return tm, tn, tk, D_pad


# ---------------------------------------------------------------------------
# Public wrapper
# ---------------------------------------------------------------------------
@functools.partial(
    jax.jit, static_argnames=("compute_dtype", "allow_small_fallback", "_force_path"))
def linear_classifier(x, weight, bias, *, compute_dtype=None,
                      allow_small_fallback=True, _force_path=None):
    """Forward of nn.Linear: y = x @ weight.T + bias.

    x:      [B, D]
    weight: [C, D]  (PyTorch layout)
    bias:   [C]
    compute_dtype: optional MXU input dtype (e.g. jnp.bfloat16); accumulation
                   is always f32.
    """
    B, D = x.shape
    C, D2 = weight.shape
    assert D == D2, "feature dim mismatch"
    assert bias.shape == (C,)

    out_dtype = x.dtype

    # Toy problems: fixed pallas_call/grid overhead dominates; let XLA fuse it.
    if allow_small_fallback and _force_path is None and B * D * C <= (1 << 16):
        return (x @ weight.T + bias.astype(out_dtype)).astype(out_dtype)

    cdt = jnp.dtype(compute_dtype) if compute_dtype is not None else jnp.dtype(x.dtype)
    in_esize = cdt.itemsize
    out_esize = jnp.dtype(out_dtype).itemsize

    # One-time transpose to [D, C]: plain K-major contraction for the MXU
    # (no risk of per-tile XLU transposes from a trans-RHS dot_general).
    x_c = x.astype(cdt)
    w_t = weight.T.astype(cdt)
    b2 = bias.astype(jnp.float32).reshape(1, C)

    tm_res = None
    if _force_path != "tiled":
        tm_res = _plan_resident(B, D, C, in_esize, out_esize)
    if _force_path == "resident" and tm_res is None:
        raise ValueError("resident path requested but weight does not fit VMEM")

    if tm_res is not None:
        # ---- Weight-resident path: weight/bias DMA'd once, single K pass ----
        tm = tm_res
        grid = (pl.cdiv(B, tm),)
        return pl.pallas_call(
            _resident_kernel,
            out_shape=jax.ShapeDtypeStruct((B, C), out_dtype),
            grid=grid,
            in_specs=[
                pl.BlockSpec((tm, D), lambda i: (i, 0)),   # stream x
                pl.BlockSpec((D, C), lambda i: (0, 0)),    # whole weight, resident
                pl.BlockSpec((1, C), lambda i: (0, 0)),    # bias, resident
            ],
            out_specs=pl.BlockSpec((tm, C), lambda i: (i, 0)),
            compiler_params=pltpu.CompilerParams(
                dimension_semantics=("parallel",),
                vmem_limit_bytes=_VMEM_LIMIT_BYTES,
            ),
        )(x_c, w_t, b2)

    # ---- Tiled (M, N, K) path for large weights ----
    tm, tn, tk, D_pad = _plan_tiled(B, D, C)
    if D_pad != D:
        # Zero-pad ONLY the contraction dim (required so garbage never
        # accumulates into valid outputs); B/C raggedness is handled by Pallas
        # edge blocks, whose out-of-range rows/cols are never stored.
        x_c = jnp.pad(x_c, ((0, 0), (0, D_pad - D)))
        w_t = jnp.pad(w_t, ((0, D_pad - D), (0, 0)))

    grid = (pl.cdiv(B, tm), pl.cdiv(C, tn), D_pad // tk)   # reduction axis last
    out = pl.pallas_call(
        _tiled_kernel,
        out_shape=jax.ShapeDtypeStruct((B, C), jnp.float32),  # f32 accumulator
        grid=grid,
        in_specs=[
            pl.BlockSpec((tm, tk), lambda i, j, k: (i, k)),
            pl.BlockSpec((tk, tn), lambda i, j, k: (k, j)),
            pl.BlockSpec((1, tn), lambda i, j, k: (0, j)),
        ],
        out_specs=pl.BlockSpec((tm, tn), lambda i, j, k: (i, j)),
        compiler_params=pltpu.CompilerParams(
            dimension_semantics=("parallel", "parallel", "arbitrary"),
            vmem_limit_bytes=_VMEM_LIMIT_BYTES,
        ),
    )(x_c, w_t, b2)
    return out.astype(out_dtype)


if __name__ == "__main__":
    # --- Small shapes consistent with the module: x [B, input_dim] ---
    B, INPUT_DIM, NUM_CLASSES = 8, 32, 16

    key = jax.random.PRNGKey(0)
    kx, kw, kb = jax.random.split(key, 3)

    x = jax.random.normal(kx, (B, INPUT_DIM), dtype=jnp.float32)
    bound = 1.0 / (INPUT_DIM ** 0.5)
    weight = jax.random.uniform(kw, (NUM_CLASSES, INPUT_DIM), dtype=jnp.float32,
                                minval=-bound, maxval=bound)
    bias = jax.random.uniform(kb, (NUM_CLASSES,), dtype=jnp.float32,
                              minval=-bound, maxval=bound)

    # Force the Pallas path (default would take the tiny-problem XLA fallback).
    out = jax.block_until_ready(
        linear_classifier(x, weight, bias, allow_small_fallback=False))
    ref = x @ weight.T + bias
    assert out.shape == (B, NUM_CLASSES)
    assert jnp.allclose(out, ref, atol=1e-5, rtol=1e-5)

    # Default entry (tiny-problem fallback) must match too.
    out_fb = jax.block_until_ready(linear_classifier(x, weight, bias))
    assert jnp.allclose(out_fb, ref, atol=1e-5, rtol=1e-5)

    # --- Weight-resident path: multiple M tiles, ragged C (no padding/slice) ---
    k1, k2, k3 = jax.random.split(jax.random.PRNGKey(1), 3)
    B2, D2, C2 = 512, 256, 600
    x2 = jax.random.normal(k1, (B2, D2), dtype=jnp.float32)
    w2 = jax.random.normal(k2, (C2, D2), dtype=jnp.float32) * 0.05
    b2 = jax.random.normal(k3, (C2,), dtype=jnp.float32)
    out2 = jax.block_until_ready(linear_classifier(x2, w2, b2))
    ref2 = x2 @ w2.T + b2
    assert jnp.allclose(out2, ref2, atol=1e-3, rtol=1e-3)

    # --- Tiled (M, N, K) path: unaligned D (K padding), ragged C/N edge ---
    k4, k5, k6 = jax.random.split(jax.random.PRNGKey(2), 3)
    B3, D3, C3 = 264, 2500, 1000
    x3 = jax.random.normal(k4, (B3, D3), dtype=jnp.float32)
    w3 = jax.random.normal(k5, (C3, D3), dtype=jnp.float32) * 0.02
    b3 = jax.random.normal(k6, (C3,), dtype=jnp.float32)
    out3 = jax.block_until_ready(
        linear_classifier(x3, w3, b3, _force_path="tiled"))
    ref3 = x3 @ w3.T + b3
    assert jnp.allclose(out3, ref3, atol=2e-3, rtol=2e-3)

    # --- Optional bf16-compute path (f32 accumulation) ---
    out4 = jax.block_until_ready(
        linear_classifier(x3, w3, b3, compute_dtype=jnp.bfloat16))
    assert jnp.mean(jnp.abs(out4 - ref3)) < 0.1

    print("KERNEL_OK")
</pallas_src>

<mosaic_0001>
module attributes {stable_mosaic.version = 11 : i64} {
  func.func @_resident_kernel(%arg0: i32, %arg1: memref<8x32xf32, #tpu.memory_space<vmem>>, %arg2: memref<32x16xf32, #tpu.memory_space<vmem>>, %arg3: memref<1x16xf32, #tpu.memory_space<vmem>>, %arg4: memref<8x16xf32, #tpu.memory_space<vmem>>) attributes {dimension_semantics = [#tpu.dimension_semantics<parallel>], iteration_bounds = array<i64: 1>, scalar_prefetch = 0 : i64, scratch_operands = 0 : i64, tpu.core_type = #tpu.core_type<tc>, window_params = [{transform_indices = @transform_0, window_bounds = array<i64: 8, 32>}, {pipeline_mode = #tpu.pipeline_mode<synchronous>, transform_indices = @transform_1, window_bounds = array<i64: 32, 16>}, {pipeline_mode = #tpu.pipeline_mode<synchronous>, transform_indices = @transform_2, window_bounds = array<i64: 1, 16>}, {transform_indices = @transform_3, window_bounds = array<i64: 8, 16>}]} {
    %c0 = arith.constant 0 : index
    %c0_0 = arith.constant 0 : index
    %0 = vector.load %arg1[%c0, %c0_0] : memref<8x32xf32, #tpu.memory_space<vmem>>, vector<8x32xf32>
    %c0_1 = arith.constant 0 : index
    %c0_2 = arith.constant 0 : index
    %1 = vector.load %arg2[%c0_1, %c0_2] : memref<32x16xf32, #tpu.memory_space<vmem>>, vector<32x16xf32>
    %cst = arith.constant dense<0.000000e+00> : vector<8x16xf32>
    %2 = tpu.matmul %0, %1, %cst {dimension_numbers = #tpu.dot_dimension_numbers<[1], [0], [0], [1], [0, 0, 1, 1], [], []>} : vector<8x32xf32>, vector<32x16xf32>, vector<8x16xf32> -> vector<8x16xf32>
    %c0_3 = arith.constant 0 : index
    %c0_4 = arith.constant 0 : index
    %3 = vector.load %arg3[%c0_3, %c0_4] : memref<1x16xf32, #tpu.memory_space<vmem>>, vector<1x16xf32>
    %4 = vector.broadcast %3 : vector<1x16xf32> to vector<8x16xf32>
    %5 = arith.addf %2, %4 : vector<8x16xf32>
    %c0_5 = arith.constant 0 : index
    %c0_6 = arith.constant 0 : index
    %6 = vector.load %arg4[%c0_5, %c0_6] : memref<8x16xf32, #tpu.memory_space<vmem>>, vector<8x16xf32>
    tpu.vector_store %arg4[%c0_5, %c0_6], %5 {strides = array<i32>} : memref<8x16xf32, #tpu.memory_space<vmem>>, vector<8x16xf32>,
    return
  }
  func.func @transform_0(%arg0: i32) -> (i32, i32) {
    %c0_i32 = arith.constant 0 : i32
    %c0_i32_0 = arith.constant 0 : i32
    return %arg0, %c0_i32 : i32, i32
  }
  func.func @transform_1(%arg0: i32) -> (i32, i32) {
    %c0_i32 = arith.constant 0 : i32
    %c0_i32_0 = arith.constant 0 : i32
    %c0_i32_1 = arith.constant 0 : i32
    return %c0_i32, %c0_i32_0 : i32, i32
  }
  func.func @transform_2(%arg0: i32) -> (i32, i32) {
    %c0_i32 = arith.constant 0 : i32
    %c0_i32_0 = arith.constant 0 : i32
    %c0_i32_1 = arith.constant 0 : i32
    return %c0_i32, %c0_i32_0 : i32, i32
  }
  func.func @transform_3(%arg0: i32) -> (i32, i32) {
    %c0_i32 = arith.constant 0 : i32
    %c0_i32_0 = arith.constant 0 : i32
    return %arg0, %c0_i32 : i32, i32
  }
}

</mosaic_0001>

<bundles_post_ra>
// kernel: linear_classifier.1
= control target key start
LH: loop header
LB: loop body
LE: loop exit
PB: predicated region body
PF: predicated region fallthrough
CT: control target
= control target key end

     0   :  { %s137_s0 = inlined_call_operand.vmem [shape: f32[8,32], index: 0, kind: input, shape index: {}]   ;;  %s138_s1 = inlined_call_operand.vmem [shape: f32[32,16], index: 1, kind: input, shape index: {}]   ;;  %s139_s2 = inlined_call_operand.vmem [shape: f32[1,16], index: 2, kind: input, shape index: {}]   ;;  %s140_s3 = inlined_call_operand.hbm [shape: f32[8,16], index: 3, kind: output, shape index: {}]  }
   0x1   :  { %v19_v0 = vld [vmem:[%s138_s1 + $0x18] sm:$0xff]  ;;  %v18_v1 = vld [vmem:[%s138_s1 + $0x10] sm:$0xff]  ;;  %v17_v2 = vld [vmem:[%s138_s1 + $0x8] sm:$0xff] }
   0x2   :  { %40 = vmatpush.msra.mxu0 %v19_v0 }
   0x3   :  { %8 = vsyncpa [#allocation3], 0  ;;  %v16_v3 = vld [vmem:[%s138_s1] sm:$0xff]  ;;  %vm24_vm0 = vcmask 261120   ;;  %s95_s24 = smov [#allocation2]   ;;  %s57_s28 = sshll.u32 %s140_s3, 4  ;;  %s58_s28 = int_to_ptr.hbm [resolvable:$true] %s57_s28 }
   0x4   :  { %41 = vmatpush.msra.mxu0 %v18_v1  ;;  %v15_v4 = vld [vmem:[%s137_s0] sm:$0xff]  ;;  %s55_s25 = sshll.u32 %s95_s24, 4  ;;  %vm48_vm1 = vcmask 130048   ;;  %s56_s25 = int_to_ptr.vmem [resolvable:$true] %s55_s25 }
   0x5   :  { %v68_v5 = vld [vmem:[%s139_s2] ss:$0 sm:$0xff] }
   0x6   :  { %42 = vmatpush.msra.mxu0 %v17_v2 }
   0x8   :  { %43 = vmatpush.msra.mxu0 %v16_v3 }
   0x9   :  { %66 = vmatmul.msk.f32.vlgmr.msra.gmra.mxu0 %vm24_vm0, %v15_v4 }
  0x86   :  { %v45_v6 = vpop.f32.mrf.mxu0 }
  0x87   :  { %v46_v7 = vadd.f32 %v68_v5, %v45_v6 }
  0x89   :  { %49 = vst.msk [vmem:[#allocation2] sm:$0xff] %vm48_vm1, %v46_v7 }
  0x8a   :  { %60 = dma.vmem_to_hbm [thread:$0]  %s56_s25, 128, %s58_s28, [#allocation3]  }
  0x8b   :  { %93 = dma.done.wait [#allocation3], 128  }
  0x8c   :  { %94 = vsyncadd [#allocation3], 4294967168 }
  0x8d   :  { %65 = vsyncpa [#allocation3], 1 }

</bundles_post_ra>
